<compile_context>
chip_gen: v7x
topology: tpu7x:2x2x1
jax: 0.10.0
libtpu: 0.0.40
codegen_flags: <defaults>
</compile_context>

<pallas_src>
import functools

import jax
import jax.numpy as jnp
from jax import lax
from jax.experimental import pallas as pl
from jax.experimental.pallas import tpu as pltpu


_LANE = 128
_MXU = 256
# Budget for double-buffered x/out blocks + weight buffers: comfortably
# inside v5e's default scoped VMEM and far under v7x's 64 MiB physical VMEM.
_VMEM_TILE_BUDGET = 12 * 1024 * 1024
_VMEM_LIMIT = 32 * 1024 * 1024


# ----------------------------------------------------------------------------
# Pallas kernel: one GEMM tile
#   w_ref : (Cout, Cin)   channel-mixing matrix (grid-invariant)
#   x_ref : (Cin, tS)     flattened spatial columns of one image
#   o_ref : (Cout, tS)    output tile
# ----------------------------------------------------------------------------
def _mm_kernel(w_ref, x_ref, o_ref):
    o_ref[...] = jnp.dot(
        w_ref[...], x_ref[...], preferred_element_type=jnp.float32
    ).astype(o_ref.dtype)


def _pick_spatial_tile(Mo, Cin, Cout, itemsize):
    """Lane-dense spatial tile, 256-aligned for the MXU, VMEM-budget capped."""
    if Mo <= _LANE:
        return Mo                          # full-dim block is always legal
    w_bytes = 2 * Cout * Cin * itemsize    # double-buffered weight
    per_col = 2 * (Cin + Cout) * itemsize  # double-buffered x + out columns
    cap = max(_LANE, (_VMEM_TILE_BUDGET - w_bytes) // per_col)
    tS = min(2048, Mo, cap)
    if tS >= _MXU:
        tS = (tS // _MXU) * _MXU           # full 256x256 MXU occupancy
    else:
        tS = (tS // _LANE) * _LANE         # at least lane-dense
    return int(tS)


# ----------------------------------------------------------------------------
# conv1x1.forward
# ----------------------------------------------------------------------------
@functools.partial(jax.jit, static_argnames=("stride", "compute_dtype"))
def conv1x1_forward(x_nchw, w_oihw, *, stride=1, compute_dtype=None):
    N, Cin, H, W = x_nchw.shape
    Cout = w_oihw.shape[0]
    out_dtype = x_nchw.dtype

    # kernel_size=1, padding=0: stride is pure spatial subsampling.
    # TODO(synk): fold the H/W stride into the BlockSpec index_map / a strided
    # pl.ds so stride>1 avoids the XLA-materialized strided-slice copy.
    if stride != 1:
        x_nchw = x_nchw[:, :, ::stride, ::stride]
    Ho, Wo = x_nchw.shape[2], x_nchw.shape[3]
    Mo = Ho * Wo

    x = x_nchw.reshape(N, Cin, Mo)     # free contiguous reshape (no transpose)
    w = w_oihw.reshape(Cout, Cin)      # free

    if compute_dtype is not None:      # bf16 MXU path on v6e/v7x
        x = x.astype(compute_dtype)
        w = w.astype(compute_dtype)

    itemsize = jnp.dtype(x.dtype).itemsize
    tS = _pick_spatial_tile(Mo, Cin, Cout, itemsize)
    grid = (N, pl.cdiv(Mo, tS))

    cost = pl.CostEstimate(
        flops=2 * N * Mo * Cin * Cout,
        transcendentals=0,
        bytes_accessed=(N * Mo * (Cin + Cout) + Cin * Cout) * itemsize,
    )

    # TODO(synk): for very large Cin on v7x, add a K grid axis with an f32
    # VMEM accumulator (pl.when init/finalize) instead of one whole-Cin dot.
    out = pl.pallas_call(
        _mm_kernel,
        out_shape=jax.ShapeDtypeStruct((N, Cout, Mo), out_dtype),
        grid=grid,
        in_specs=[
            # Grid-invariant weight block: Pallas DMAs it once and keeps it
            # resident (single extra buffer is negligible; Buffered(1) would
            # shave it further if needed for huge channel counts).
            pl.BlockSpec((Cout, Cin), lambda n, s: (0, 0)),
            pl.BlockSpec((None, Cin, tS), lambda n, s: (n, 0, s)),
        ],
        out_specs=pl.BlockSpec((None, Cout, tS), lambda n, s: (n, 0, s)),
        compiler_params=pltpu.CompilerParams(
            dimension_semantics=("parallel", "parallel"),
            vmem_limit_bytes=_VMEM_LIMIT,
        ),
        cost_estimate=cost,
    )(w, x)

    return out.reshape(N, Cout, Ho, Wo)


# ----------------------------------------------------------------------------
# Parameter setup (glue, runs once at init — not a kernel)
# ----------------------------------------------------------------------------
def _spectral_normalize(w_oihw, n_iter=50, eps=1e-12):
    """W / sigma_max(W), sigma via power iteration on (Cout, Cin*kh*kw)."""
    cout = w_oihw.shape[0]
    wm = w_oihw.reshape(cout, -1)
    u = jnp.ones((cout,), w_oihw.dtype) / jnp.sqrt(jnp.asarray(cout, w_oihw.dtype))
    v = wm.T @ u
    v = v / (jnp.linalg.norm(v) + eps)
    for _ in range(n_iter):
        u = wm @ v
        u = u / (jnp.linalg.norm(u) + eps)
        v = wm.T @ u
        v = v / (jnp.linalg.norm(v) + eps)
    sigma = u @ (wm @ v)
    return w_oihw / sigma


def init_conv1x1_params(key, in_channels, out_channels):
    w = jax.random.normal(key, (out_channels, in_channels, 1, 1), jnp.float32) * 0.2
    return _spectral_normalize(w)


# ----------------------------------------------------------------------------
# pure-JAX reference (sanity check)
# ----------------------------------------------------------------------------
def _ref_forward(x_nchw, w_oihw, stride=1):
    return lax.conv_general_dilated(
        x_nchw, w_oihw, window_strides=(stride, stride), padding="VALID",
        dimension_numbers=("NCHW", "OIHW", "NCHW"))


if __name__ == "__main__":
    key = jax.random.PRNGKey(0)
    kx, kp = jax.random.split(key)

    N, Cin, H, W = 2, 4, 16, 16
    Cout = 8
    x = jax.random.normal(kx, (N, Cin, H, W), jnp.float32)
    w = init_conv1x1_params(kp, Cin, Cout)

    # stride=1 (module default), f32
    out = jax.block_until_ready(conv1x1_forward(x, w, stride=1))
    assert out.shape == (N, Cout, H, W), out.shape
    ref = _ref_forward(x, w, 1)
    assert jnp.allclose(out, ref, atol=1e-5, rtol=1e-5), float(
        jnp.max(jnp.abs(out - ref)))

    # stride=2 path (supported by the module signature)
    out2 = jax.block_until_ready(conv1x1_forward(x, w, stride=2))
    assert out2.shape == (N, Cout, H // 2, W // 2), out2.shape
    ref2 = _ref_forward(x, w, 2)
    assert jnp.allclose(out2, ref2, atol=1e-5, rtol=1e-5), float(
        jnp.max(jnp.abs(out2 - ref2)))

    # bf16 MXU path (v6e/v7x fast path) — loose tolerance, f32 accumulation.
    out_bf = jax.block_until_ready(
        conv1x1_forward(x, w, stride=1, compute_dtype=jnp.bfloat16))
    assert out_bf.shape == (N, Cout, H, W), out_bf.shape
    assert jnp.allclose(out_bf, ref, atol=1e-1), float(
        jnp.max(jnp.abs(out_bf - ref)))

    print("KERNEL_OK")
</pallas_src>

<mosaic_0001>
module attributes {stable_mosaic.version = 11 : i64} {
  func.func @_mm_kernel(%arg0: i32, %arg1: i32, %arg2: memref<8x4xf32, #tpu.memory_space<vmem>>, %arg3: memref<1x4x256xf32, #tpu.memory_space<vmem>>, %arg4: memref<1x8x256xf32, #tpu.memory_space<vmem>>) attributes {dimension_semantics = [#tpu.dimension_semantics<parallel>, #tpu.dimension_semantics<parallel>], iteration_bounds = array<i64: 2, 1>, scalar_prefetch = 0 : i64, scratch_operands = 0 : i64, tpu.core_type = #tpu.core_type<tc>, window_params = [{pipeline_mode = #tpu.pipeline_mode<synchronous>, transform_indices = @transform_0, window_bounds = array<i64: 8, 4>}, {transform_indices = @transform_1, window_bounds = array<i64: 1, 4, 256>}, {transform_indices = @transform_2, window_bounds = array<i64: 1, 8, 256>}]} {
    %c0 = arith.constant 0 : index
    %c0_0 = arith.constant 0 : index
    %0 = vector.load %arg2[%c0, %c0_0] : memref<8x4xf32, #tpu.memory_space<vmem>>, vector<8x4xf32>
    %c0_1 = arith.constant 0 : index
    %c0_2 = arith.constant 0 : index
    %c0_3 = arith.constant 0 : index
    %1 = vector.load %arg3[%c0_1, %c0_2, %c0_3] : memref<1x4x256xf32, #tpu.memory_space<vmem>>, vector<1x4x256xf32>
    %2 = vector.shape_cast %1 : vector<1x4x256xf32> to vector<4x256xf32>
    %cst = arith.constant dense<0.000000e+00> : vector<8x256xf32>
    %3 = tpu.matmul %0, %2, %cst {dimension_numbers = #tpu.dot_dimension_numbers<[1], [0], [0], [1], [0, 0, 1, 1], [], []>} : vector<8x4xf32>, vector<4x256xf32>, vector<8x256xf32> -> vector<8x256xf32>
    %c0_4 = arith.constant 0 : index
    %c0_5 = arith.constant 0 : index
    %c0_6 = arith.constant 0 : index
    %4 = vector.load %arg4[%c0_4, %c0_5, %c0_6] : memref<1x8x256xf32, #tpu.memory_space<vmem>>, vector<1x8x256xf32>
    %5 = vector.shape_cast %4 : vector<1x8x256xf32> to vector<8x256xf32>
    %6 = vector.shape_cast %3 : vector<8x256xf32> to vector<1x8x256xf32>
    tpu.vector_store %arg4[%c0_4, %c0_5, %c0_6], %6 {strides = array<i32>} : memref<1x8x256xf32, #tpu.memory_space<vmem>>, vector<1x8x256xf32>,
    return
  }
  func.func @transform_0(%arg0: i32, %arg1: i32) -> (i32, i32) {
    %c0_i32 = arith.constant 0 : i32
    %c0_i32_0 = arith.constant 0 : i32
    %c0_i32_1 = arith.constant 0 : i32
    return %c0_i32, %c0_i32_0 : i32, i32
  }
  func.func @transform_1(%arg0: i32, %arg1: i32) -> (i32, i32, i32) {
    %c0_i32 = arith.constant 0 : i32
    %c0_i32_0 = arith.constant 0 : i32
    return %arg0, %c0_i32, %arg1 : i32, i32, i32
  }
  func.func @transform_2(%arg0: i32, %arg1: i32) -> (i32, i32, i32) {
    %c0_i32 = arith.constant 0 : i32
    %c0_i32_0 = arith.constant 0 : i32
    return %arg0, %c0_i32, %arg1 : i32, i32, i32
  }
}

</mosaic_0001>

<bundles_post_ra>
// kernel: conv1x1_forward.1
= control target key start
LH: loop header
LB: loop body
LE: loop exit
PB: predicated region body
PF: predicated region fallthrough
CT: control target
= control target key end

     0   :  { %s438_s9 = smov 0   ;;  %s440_s10 = smov 0   ;;  %s471_s0 = inlined_call_operand.vmem [shape: f32[8,4], index: 0, kind: input, shape index: {}]   ;;  %s472_s1 = inlined_call_operand.vmem [shape: f32[2,4,256], index: 1, kind: input, shape index: {}]   ;;  %s473_s2 = inlined_call_operand.vmem [shape: f32[2,8,256], index: 2, kind: output, shape index: {}]  }
   0x1   :  { %s442_s11 = smov 0  }
   0x2 LB: > { %s24_s12 = sadd.s32 1, %s416_s10  ;;  %p360_p0 = scmp.ge.s32.totalorder %s420_s11, 1  ;;  %s420_s11 = sphi %s442_s11, %s12_s11   ;;  %s416_s10 = sphi %s440_s10, %s475_s10   ;;  %s412_s9 = sphi %s438_s9, %s474_s9  }
   0x3   : > { %p26_p1 = scmp.ge.s32.totalorder %s24_s12, 2  ;;  %p133_p2 = scmp.lt.s32.totalorder %s420_s11, 3 }
   0x5   : > { %s477_s12 = smov (%p26_p1, %s24_s12), 0  ;;  %p134_p3 = pnand %p360_p0, %p133_p2 }
   0x6   : > { %p164_p4 = scmp.lt.s32.totalorder (!%p134_p3), %s412_s9, 1  ;;  %v422_v0 = vmov (!%p134_p3), 0.0   ;;  %vm191_vm0 = vcmask (!%p134_p3), 1043456   ;;  %v183_v3 = vld [vmem:[%s471_s0] sm:$0xff] (!%p134_p3)  ;;  %vm187_vm1 = vcmask (!%p134_p3), 31744  }
   0x7   : > { %137 = sbr.rel (%p134_p3) target bundleno = 236 (0xec), region = 28  ;;  %260 = vmatprep.mubr.f32.mxu0 (!%p134_p3), %v422_v0 }
   0xe   : > { %s479_s9 = smov (!%p164_p4, %s412_s9), 1 }
   0xf   : > { %s370_s13 = sshll.u32 %s479_s9, 3  ;;  %s371_s19 = sshll.u32 %s479_s9, 4 }
  0x10   : > { %s171_s16 = scalar_lea.vmem %s472_s1, %s370_s13  ;;  %s181_s22 = scalar_lea.vmem %s473_s2, %s371_s19 }
  0x11   : > { %v184_v1 = vld [vmem:[%s171_s16] sm:$0xff] }
  0x12   : > { %v186_v2 = vcombine.high %v184_v1, %v184_v1 }
  0x14   : > { %365 = vmatprep.subr.msk.mxu0 %vm191_vm0, %v186_v2 }
  0x15   : > { %366 = vmatpush1.msk.msra.mxu0 %vm191_vm0, %v184_v1 }
  0x16   : > { %367 = vmatmul.mubr.msk.f32.vlgmr.msra.gmra.mrb[0].mxu0 %vm187_vm1, %v183_v3 }
  0xe9   : > { %v262_v4 = vpop.f32.mrb[0].mxu0 }
  0xea   : > { %267 = vst [vmem:[%s181_s22] sm:$0xff] %v262_v4  ;;  %v264_v5 = vpop.f32.mrb[1].mxu0 }
  0xeb   : > { %268 = vst [vmem:[%s181_s22 + $0x8] sm:$0xff] %v264_v5 }
  0xec PF: > { %s12_s11 = sadd.s32 1, %s420_s11   ;;  %s474_s9 = smov %s416_s10 }
  0xed   : > { %p9_p5 = scmp.ge.s32.totalorder %s12_s11, 4   ;;  %s475_s10 = smov %s477_s12 }
  0xef   :  { %11 = sbr.rel (!%p9_p5) target bundleno = 2 (0x2), region = 58 }

</bundles_post_ra>
